<compile_context>
chip_gen: v6e
topology: v6e:2x2x1
jax: 0.10.0
libtpu: 0.0.40
codegen_flags: <defaults>
</compile_context>

<pallas_src>
import functools

import jax
import jax.numpy as jnp
from jax.experimental import pallas as pl
from jax.experimental.pallas import tpu as pltpu


def _round_up(x, m):
    return ((x + m - 1) // m) * m


# ---------------------------------------------------------------------------
# Parameter slab layouts (weight slab W, vector slab V)
# ---------------------------------------------------------------------------
def _w_layout(input_dim, hidden_dim, num_scenarios):
    """All weight matrices packed along lanes, each at a 128-aligned column."""
    H, S = hidden_dim, num_scenarios
    segs = [
        ("enc_w1", input_dim, H),
        ("enc_w2", H, H),
        ("gen_w1", H, H),
        ("gen_w2", H, H * S),
        ("dec_w1", H, H),
        ("dec_w2", H, input_dim),
        ("pe_w1", H, H // 2),
    ]
    layout, off = {}, 0
    for name, rows, width in segs:
        layout[name] = (rows, off, width)
        off += _round_up(width, 128)
    n_rows = _round_up(max(input_dim, H), 8)
    return layout, n_rows, off


def _v_layout(input_dim, hidden_dim, num_scenarios):
    """All 1-row vectors (biases, LN gains, prob-head row/scalar) as slab rows."""
    H = hidden_dim
    widths = {
        "enc_b1": H, "enc_g": H, "enc_be": H, "enc_b2": H,
        "gen_b1": H, "gen_g": H, "gen_be": H, "gen_b2": H * num_scenarios,
        "dec_b1": H, "dec_g": H, "dec_be": H, "dec_b2": input_dim,
        "pe_b1": H // 2, "pe_w2t": H // 2, "pe_b2": 1,
    }
    layout = {name: (row, w) for row, (name, w) in enumerate(widths.items())}
    n_rows = _round_up(len(widths), 8)
    n_lanes = _round_up(max(widths.values()), 128)
    return layout, n_rows, n_lanes


# ---------------------------------------------------------------------------
# Fused forward kernel
# ---------------------------------------------------------------------------
def _make_fused_kernel(B, S, H, input_dim, has_condition, prob_pad,
                       w_layout, v_layout):
    def kernel(*refs):
        if has_condition:
            (x_ref, c_ref, w_ref, v_ref,
             scen_ref, prob_ref, emb_ref, xc_scr, emb_scr) = refs
        else:
            (x_ref, w_ref, v_ref,
             scen_ref, prob_ref, emb_ref, emb_scr) = refs

        def wmat(name):
            rows, off, width = w_layout[name]
            return w_ref[0:rows, off:off + width]

        def vrow(name):
            row, width = v_layout[name]
            return v_ref[row:row + 1, 0:width]

        def mlp(inp, pfx):
            # Linear -> LayerNorm(eps=1e-5, affine) -> ReLU -> Linear (nn.Sequential)
            h = jnp.dot(inp, wmat(pfx + "_w1"),
                        preferred_element_type=jnp.float32) + vrow(pfx + "_b1")
            mu = jnp.mean(h, axis=-1, keepdims=True)
            var = jnp.mean((h - mu) ** 2, axis=-1, keepdims=True)
            h = (h - mu) * jax.lax.rsqrt(var + 1e-5)
            h = h * vrow(pfx + "_g") + vrow(pfx + "_be")
            h = jnp.maximum(h, 0.0)
            return jnp.dot(h, wmat(pfx + "_w2"),
                           preferred_element_type=jnp.float32) + vrow(pfx + "_b2")

        # ---- encoder (x and condition share one batched 2B-row pass) ----
        if has_condition:
            xc_scr[0:B, :] = x_ref[...]
            xc_scr[B:2 * B, :] = c_ref[...]
            enc = mlp(xc_scr[...], "enc")                       # (2B, H)
            enc = enc[0:B, :] + enc[B:2 * B, :]                 # (B, H)
        else:
            enc = mlp(x_ref[...], "enc")                        # (B, H)

        # ---- generator: one wide matmul to (B, S*H); also the embeddings output ----
        scen_wide = mlp(enc, "gen")                             # (B, S*H)
        emb_ref[...] = scen_wide.astype(emb_ref.dtype)

        # ---- restack to (S*B, H): row s*B + b = embedding of (batch b, scenario s) ----
        for s in range(S):
            emb_scr[s * B:(s + 1) * B, :] = scen_wide[:, s * H:(s + 1) * H]
        emb_flat = emb_scr[...]                                 # (S*B, H)

        # ---- decoder: ONE batched pass over all B*S scenario embeddings ----
        dec_flat = mlp(emb_flat, "dec")                         # (S*B, input_dim)
        for s in range(S):
            scen_ref[:, s * input_dim:(s + 1) * input_dim] = (
                dec_flat[s * B:(s + 1) * B, :].astype(scen_ref.dtype))

        # ---- probability head: ONE batched pass ----
        ph = jnp.maximum(
            jnp.dot(emb_flat, wmat("pe_w1"),
                    preferred_element_type=jnp.float32) + vrow("pe_b1"), 0.0)
        p_flat = jax.nn.sigmoid(
            jnp.sum(ph * vrow("pe_w2t"), axis=-1, keepdims=True) + vrow("pe_b2"))

        # place the S columns into a lane-dense (B, prob_pad) slab and normalize
        lane = jax.lax.broadcasted_iota(jnp.int32, (B, prob_pad), 1)
        probs = jnp.zeros((B, prob_pad), jnp.float32)
        for s in range(S):
            probs = jnp.where(lane == s, p_flat[s * B:(s + 1) * B, :], probs)
        denom = jnp.sum(probs, axis=-1, keepdims=True)          # pad lanes are zero
        prob_ref[...] = (probs / denom).astype(prob_ref.dtype)  # exact divide

    return kernel


# ---------------------------------------------------------------------------
# Forward pass wrapper (single pallas_call; wrapper reshapes are free views)
# ---------------------------------------------------------------------------
def scenario_generator_forward(packed_params, x, condition=None, *,
                               num_scenarios, hidden_dim):
    W, V = packed_params
    B, input_dim = x.shape
    S, H = num_scenarios, hidden_dim
    has_condition = condition is not None
    prob_pad = _round_up(S, 128)

    w_layout, _, _ = _w_layout(input_dim, H, S)
    v_layout, _, _ = _v_layout(input_dim, H, S)
    kernel = _make_fused_kernel(B, S, H, input_dim, has_condition, prob_pad,
                                w_layout, v_layout)

    vmem = pl.BlockSpec(memory_space=pltpu.MemorySpace.VMEM)
    args = (x, condition, W, V) if has_condition else (x, W, V)

    scratch_shapes = []
    if has_condition:
        scratch_shapes.append(pltpu.VMEM((2 * B, input_dim), jnp.float32))
    scratch_shapes.append(pltpu.VMEM((S * B, H), jnp.float32))

    scen_flat, probs_pad, emb_wide = pl.pallas_call(
        kernel,
        out_shape=(jax.ShapeDtypeStruct((B, S * input_dim), jnp.float32),
                   jax.ShapeDtypeStruct((B, prob_pad), jnp.float32),
                   jax.ShapeDtypeStruct((B, S * H), jnp.float32)),
        in_specs=[vmem] * len(args),
        out_specs=(vmem, vmem, vmem),
        scratch_shapes=scratch_shapes,
    )(*args)

    return {
        "scenarios": scen_flat.reshape(B, S, input_dim),   # free view (row-major)
        "probabilities": probs_pad[:, :S],
        "embeddings": emb_wide.reshape(B, S, H),           # free view (matches .view)
    }


# TODO(synk): evaluate_scenario (cosine-similarity scoring helper) is not part of
#             forward(); not implemented here.


# ---------------------------------------------------------------------------
# Parameter init (PyTorch nn.Linear-style uniform(-1/sqrt(fan_in))) + slab packing
# ---------------------------------------------------------------------------
def init_params(key, input_dim, hidden_dim, num_scenarios):
    def linear(k, fan_in, fan_out):
        k1, k2 = jax.random.split(k)
        bound = 1.0 / jnp.sqrt(jnp.float32(fan_in))
        w = jax.random.uniform(k1, (fan_in, fan_out), jnp.float32, -bound, bound)
        b = jax.random.uniform(k2, (1, fan_out), jnp.float32, -bound, bound)
        return w, b

    keys = jax.random.split(key, 8)
    p = {}
    # encoder: Linear(in, H) -> LN(H) -> ReLU -> Linear(H, H)
    p["enc_w1"], p["enc_b1"] = linear(keys[0], input_dim, hidden_dim)
    p["enc_g"] = jnp.ones((1, hidden_dim), jnp.float32)
    p["enc_be"] = jnp.zeros((1, hidden_dim), jnp.float32)
    p["enc_w2"], p["enc_b2"] = linear(keys[1], hidden_dim, hidden_dim)
    # generator: Linear(H, H) -> LN(H) -> ReLU -> Linear(H, H*S)
    p["gen_w1"], p["gen_b1"] = linear(keys[2], hidden_dim, hidden_dim)
    p["gen_g"] = jnp.ones((1, hidden_dim), jnp.float32)
    p["gen_be"] = jnp.zeros((1, hidden_dim), jnp.float32)
    p["gen_w2"], p["gen_b2"] = linear(keys[3], hidden_dim, hidden_dim * num_scenarios)
    # decoder: Linear(H, H) -> LN(H) -> ReLU -> Linear(H, in)
    p["dec_w1"], p["dec_b1"] = linear(keys[4], hidden_dim, hidden_dim)
    p["dec_g"] = jnp.ones((1, hidden_dim), jnp.float32)
    p["dec_be"] = jnp.zeros((1, hidden_dim), jnp.float32)
    p["dec_w2"], p["dec_b2"] = linear(keys[5], hidden_dim, input_dim)
    # probability estimator: Linear(H, H//2) -> ReLU -> Linear(H//2, 1) -> Sigmoid
    K = hidden_dim // 2
    p["pe_w1"], p["pe_b1"] = linear(keys[6], hidden_dim, K)
    k1, k2 = jax.random.split(keys[7])
    bound = 1.0 / jnp.sqrt(jnp.float32(K))
    p["pe_w2t"] = jax.random.uniform(k1, (1, K), jnp.float32, -bound, bound)  # pre-transposed
    p["pe_b2"] = jax.random.uniform(k2, (1,), jnp.float32, -bound, bound)
    return p


def pack_params(params, input_dim, hidden_dim, num_scenarios):
    """Pack all matrices into one weight slab and all row-vectors into one vector slab."""
    wl, wr, wc = _w_layout(input_dim, hidden_dim, num_scenarios)
    W = jnp.zeros((wr, wc), jnp.float32)
    for name, (rows, off, width) in wl.items():
        W = W.at[0:rows, off:off + width].set(params[name].reshape(rows, width))

    vl, vr, vc = _v_layout(input_dim, hidden_dim, num_scenarios)
    V = jnp.zeros((vr, vc), jnp.float32)
    for name, (row, width) in vl.items():
        V = V.at[row, 0:width].set(params[name].reshape(width))
    return W, V


if __name__ == "__main__":
    B, INPUT_DIM, HIDDEN_DIM, NUM_SCENARIOS = 4, 32, 64, 5
    key = jax.random.PRNGKey(0)
    pkey, xkey, ckey = jax.random.split(key, 3)

    params = init_params(pkey, INPUT_DIM, HIDDEN_DIM, NUM_SCENARIOS)
    packed = pack_params(params, INPUT_DIM, HIDDEN_DIM, NUM_SCENARIOS)
    x = jax.random.normal(xkey, (B, INPUT_DIM), jnp.float32)
    cond = jax.random.normal(ckey, (B, INPUT_DIM), jnp.float32)

    fwd = jax.jit(functools.partial(scenario_generator_forward,
                                    num_scenarios=NUM_SCENARIOS,
                                    hidden_dim=HIDDEN_DIM))

    # no-condition path
    out = jax.block_until_ready(fwd(packed, x))
    assert out["scenarios"].shape == (B, NUM_SCENARIOS, INPUT_DIM)
    assert out["probabilities"].shape == (B, NUM_SCENARIOS)
    assert out["embeddings"].shape == (B, NUM_SCENARIOS, HIDDEN_DIM)
    assert bool(jnp.allclose(jnp.sum(out["probabilities"], axis=-1), 1.0, atol=1e-5))

    # condition path (encoder batched over [x; condition] inside the kernel)
    out_c = jax.block_until_ready(fwd(packed, x, cond))
    assert out_c["scenarios"].shape == (B, NUM_SCENARIOS, INPUT_DIM)
    assert out_c["probabilities"].shape == (B, NUM_SCENARIOS)
    assert out_c["embeddings"].shape == (B, NUM_SCENARIOS, HIDDEN_DIM)
    assert bool(jnp.allclose(jnp.sum(out_c["probabilities"], axis=-1), 1.0, atol=1e-5))

    print("KERNEL_OK")
</pallas_src>

<mosaic_0001>
module attributes {stable_mosaic.version = 11 : i64} {
  func.func @kernel(%arg0: memref<4x32xf32, #tpu.memory_space<vmem>>, %arg1: memref<64x1152xf32, #tpu.memory_space<vmem>>, %arg2: memref<16x384xf32, #tpu.memory_space<vmem>>, %arg3: memref<4x160xf32, #tpu.memory_space<vmem>>, %arg4: memref<4x128xf32, #tpu.memory_space<vmem>>, %arg5: memref<4x320xf32, #tpu.memory_space<vmem>>, %arg6: memref<20x64xf32, #tpu.memory_space<vmem>>) attributes {dimension_semantics = [], scalar_prefetch = 0 : i64, scratch_operands = 1 : i64, tpu.core_type = #tpu.core_type<tc>} {
    %c0 = arith.constant 0 : index
    %c0_0 = arith.constant 0 : index
    %0 = vector.load %arg0[%c0, %c0_0] : memref<4x32xf32, #tpu.memory_space<vmem>>, vector<4x32xf32>
    %c0_1 = arith.constant 0 : index
    %c0_2 = arith.constant 0 : index
    %1 = vector.load %arg1[%c0_1, %c0_2] : memref<64x1152xf32, #tpu.memory_space<vmem>>, vector<32x64xf32>
    %cst = arith.constant dense<0.000000e+00> : vector<4x64xf32>
    %2 = tpu.matmul %0, %1, %cst {dimension_numbers = #tpu.dot_dimension_numbers<[1], [0], [0], [1], [0, 0, 1, 1], [], []>} : vector<4x32xf32>, vector<32x64xf32>, vector<4x64xf32> -> vector<4x64xf32>
    %c0_3 = arith.constant 0 : index
    %c0_4 = arith.constant 0 : index
    %3 = vector.load %arg2[%c0_3, %c0_4] : memref<16x384xf32, #tpu.memory_space<vmem>>, vector<1x64xf32>
    %4 = vector.broadcast %3 : vector<1x64xf32> to vector<4x64xf32>
    %5 = arith.addf %2, %4 : vector<4x64xf32>
    %cst_5 = arith.constant dense<0.000000e+00> : vector<4xf32>
    %6 = vector.multi_reduction <add>, %5, %cst_5 [1] : vector<4x64xf32> to vector<4xf32>
    %7 = vector.shape_cast %6 : vector<4xf32> to vector<4x1xf32>
    %cst_6 = arith.constant 6.400000e+01 : f32
    %8 = vector.broadcast %cst_6 : f32 to vector<4x1xf32>
    %9 = arith.divf %7, %8 : vector<4x1xf32>
    %10 = vector.broadcast %9 : vector<4x1xf32> to vector<4x64xf32>
    %11 = arith.subf %5, %10 : vector<4x64xf32>
    %12 = arith.mulf %11, %11 : vector<4x64xf32>
    %cst_7 = arith.constant dense<0.000000e+00> : vector<4xf32>
    %13 = vector.multi_reduction <add>, %12, %cst_7 [1] : vector<4x64xf32> to vector<4xf32>
    %14 = vector.shape_cast %13 : vector<4xf32> to vector<4x1xf32>
    %cst_8 = arith.constant 6.400000e+01 : f32
    %15 = vector.broadcast %cst_8 : f32 to vector<4x1xf32>
    %16 = arith.divf %14, %15 : vector<4x1xf32>
    %17 = vector.broadcast %9 : vector<4x1xf32> to vector<4x64xf32>
    %18 = arith.subf %5, %17 : vector<4x64xf32>
    %cst_9 = arith.constant 9.99999974E-6 : f32
    %19 = vector.broadcast %cst_9 : f32 to vector<4x1xf32>
    %20 = arith.addf %16, %19 : vector<4x1xf32>
    %21 = math.rsqrt %20 : vector<4x1xf32>
    %22 = vector.broadcast %21 : vector<4x1xf32> to vector<4x64xf32>
    %23 = arith.mulf %18, %22 : vector<4x64xf32>
    %c1 = arith.constant 1 : index
    %c0_10 = arith.constant 0 : index
    %24 = vector.load %arg2[%c1, %c0_10] : memref<16x384xf32, #tpu.memory_space<vmem>>, vector<1x64xf32>
    %25 = vector.broadcast %24 : vector<1x64xf32> to vector<4x64xf32>
    %26 = arith.mulf %23, %25 : vector<4x64xf32>
    %c2 = arith.constant 2 : index
    %c0_11 = arith.constant 0 : index
    %27 = vector.load %arg2[%c2, %c0_11] : memref<16x384xf32, #tpu.memory_space<vmem>>, vector<1x64xf32>
    %28 = vector.broadcast %27 : vector<1x64xf32> to vector<4x64xf32>
    %29 = arith.addf %26, %28 : vector<4x64xf32>
    %cst_12 = arith.constant 0.000000e+00 : f32
    %30 = vector.broadcast %cst_12 : f32 to vector<4x64xf32>
    %31 = arith.maximumf %29, %30 : vector<4x64xf32>
    %c0_13 = arith.constant 0 : index
    %c128 = arith.constant 128 : index
    %32 = vector.load %arg1[%c0_13, %c128] : memref<64x1152xf32, #tpu.memory_space<vmem>>, vector<64x64xf32>
    %cst_14 = arith.constant dense<0.000000e+00> : vector<4x64xf32>
    %33 = tpu.matmul %31, %32, %cst_14 {dimension_numbers = #tpu.dot_dimension_numbers<[1], [0], [0], [1], [0, 0, 1, 1], [], []>} : vector<4x64xf32>, vector<64x64xf32>, vector<4x64xf32> -> vector<4x64xf32>
    %c3 = arith.constant 3 : index
    %c0_15 = arith.constant 0 : index
    %34 = vector.load %arg2[%c3, %c0_15] : memref<16x384xf32, #tpu.memory_space<vmem>>, vector<1x64xf32>
    %35 = vector.broadcast %34 : vector<1x64xf32> to vector<4x64xf32>
    %36 = arith.addf %33, %35 : vector<4x64xf32>
    %c0_16 = arith.constant 0 : index
    %c256 = arith.constant 256 : index
    %37 = vector.load %arg1[%c0_16, %c256] : memref<64x1152xf32, #tpu.memory_space<vmem>>, vector<64x64xf32>
    %cst_17 = arith.constant dense<0.000000e+00> : vector<4x64xf32>
    %38 = tpu.matmul %36, %37, %cst_17 {dimension_numbers = #tpu.dot_dimension_numbers<[1], [0], [0], [1], [0, 0, 1, 1], [], []>} : vector<4x64xf32>, vector<64x64xf32>, vector<4x64xf32> -> vector<4x64xf32>
    %c4 = arith.constant 4 : index
    %c0_18 = arith.constant 0 : index
    %39 = vector.load %arg2[%c4, %c0_18] : memref<16x384xf32, #tpu.memory_space<vmem>>, vector<1x64xf32>
    %40 = vector.broadcast %39 : vector<1x64xf32> to vector<4x64xf32>
    %41 = arith.addf %38, %40 : vector<4x64xf32>
    %cst_19 = arith.constant dense<0.000000e+00> : vector<4xf32>
    %42 = vector.multi_reduction <add>, %41, %cst_19 [1] : vector<4x64xf32> to vector<4xf32>
    %43 = vector.shape_cast %42 : vector<4xf32> to vector<4x1xf32>
    %cst_20 = arith.constant 6.400000e+01 : f32
    %44 = vector.broadcast %cst_20 : f32 to vector<4x1xf32>
    %45 = arith.divf %43, %44 : vector<4x1xf32>
    %46 = vector.broadcast %45 : vector<4x1xf32> to vector<4x64xf32>
    %47 = arith.subf %41, %46 : vector<4x64xf32>
    %48 = arith.mulf %47, %47 : vector<4x64xf32>
    %cst_21 = arith.constant dense<0.000000e+00> : vector<4xf32>
    %49 = vector.multi_reduction <add>, %48, %cst_21 [1] : vector<4x64xf32> to vector<4xf32>
    %50 = vector.shape_cast %49 : vector<4xf32> to vector<4x1xf32>
    %cst_22 = arith.constant 6.400000e+01 : f32
    %51 = vector.broadcast %cst_22 : f32 to vector<4x1xf32>
    %52 = arith.divf %50, %51 : vector<4x1xf32>
    %53 = vector.broadcast %45 : vector<4x1xf32> to vector<4x64xf32>
    %54 = arith.subf %41, %53 : vector<4x64xf32>
    %cst_23 = arith.constant 9.99999974E-6 : f32
    %55 = vector.broadcast %cst_23 : f32 to vector<4x1xf32>
    %56 = arith.addf %52, %55 : vector<4x1xf32>
    %57 = math.rsqrt %56 : vector<4x1xf32>
    %58 = vector.broadcast %57 : vector<4x1xf32> to vector<4x64xf32>
    %59 = arith.mulf %54, %58 : vector<4x64xf32>
    %c5 = arith.constant 5 : index
    %c0_24 = arith.constant 0 : index
    %60 = vector.load %arg2[%c5, %c0_24] : memref<16x384xf32, #tpu.memory_space<vmem>>, vector<1x64xf32>
    %61 = vector.broadcast %60 : vector<1x64xf32> to vector<4x64xf32>
    %62 = arith.mulf %59, %61 : vector<4x64xf32>
    %c6 = arith.constant 6 : index
    %c0_25 = arith.constant 0 : index
    %63 = vector.load %arg2[%c6, %c0_25] : memref<16x384xf32, #tpu.memory_space<vmem>>, vector<1x64xf32>
    %64 = vector.broadcast %63 : vector<1x64xf32> to vector<4x64xf32>
    %65 = arith.addf %62, %64 : vector<4x64xf32>
    %cst_26 = arith.constant 0.000000e+00 : f32
    %66 = vector.broadcast %cst_26 : f32 to vector<4x64xf32>
    %67 = arith.maximumf %65, %66 : vector<4x64xf32>
    %c0_27 = arith.constant 0 : index
    %c384 = arith.constant 384 : index
    %68 = vector.load %arg1[%c0_27, %c384] : memref<64x1152xf32, #tpu.memory_space<vmem>>, vector<64x320xf32>
    %cst_28 = arith.constant dense<0.000000e+00> : vector<4x320xf32>
    %69 = tpu.matmul %67, %68, %cst_28 {dimension_numbers = #tpu.dot_dimension_numbers<[1], [0], [0], [1], [0, 0, 1, 1], [], []>} : vector<4x64xf32>, vector<64x320xf32>, vector<4x320xf32> -> vector<4x320xf32>
    %c7 = arith.constant 7 : index
    %c0_29 = arith.constant 0 : index
    %70 = vector.load %arg2[%c7, %c0_29] : memref<16x384xf32, #tpu.memory_space<vmem>>, vector<1x320xf32>
    %71 = vector.broadcast %70 : vector<1x320xf32> to vector<4x320xf32>
    %72 = arith.addf %69, %71 : vector<4x320xf32>
    %c0_30 = arith.constant 0 : index
    %c0_31 = arith.constant 0 : index
    %73 = vector.load %arg5[%c0_30, %c0_31] : memref<4x320xf32, #tpu.memory_space<vmem>>, vector<4x320xf32>
    tpu.vector_store %arg5[%c0_30, %c0_31], %72 {strides = array<i32>} : memref<4x320xf32, #tpu.memory_space<vmem>>, vector<4x320xf32>,
    %74 = vector.extract_strided_slice %72 {offsets = [0, 0], sizes = [4, 64], strides = [1, 1]} : vector<4x320xf32> to vector<4x64xf32>
    %c0_32 = arith.constant 0 : index
    %c0_33 = arith.constant 0 : index
    %75 = vector.load %arg6[%c0_32, %c0_33] : memref<20x64xf32, #tpu.memory_space<vmem>>, vector<4x64xf32>
    tpu.vector_store %arg6[%c0_32, %c0_33], %74 {strides = array<i32>} : memref<20x64xf32, #tpu.memory_space<vmem>>, vector<4x64xf32>,
    %76 = vector.extract_strided_slice %72 {offsets = [0, 64], sizes = [4, 64], strides = [1, 1]} : vector<4x320xf32> to vector<4x64xf32>
    %c4_34 = arith.constant 4 : index
    %c0_35 = arith.constant 0 : index
    %77 = vector.load %arg6[%c4_34, %c0_35] : memref<20x64xf32, #tpu.memory_space<vmem>>, vector<4x64xf32>
    tpu.vector_store %arg6[%c4_34, %c0_35], %76 {strides = array<i32>} : memref<20x64xf32, #tpu.memory_space<vmem>>, vector<4x64xf32>,
    %78 = vector.extract_strided_slice %72 {offsets = [0, 128], sizes = [4, 64], strides = [1, 1]} : vector<4x320xf32> to vector<4x64xf32>
    %c8 = arith.constant 8 : index
    %c0_36 = arith.constant 0 : index
    %79 = vector.load %arg6[%c8, %c0_36] : memref<20x64xf32, #tpu.memory_space<vmem>>, vector<4x64xf32>
    tpu.vector_store %arg6[%c8, %c0_36], %78 {strides = array<i32>} : memref<20x64xf32, #tpu.memory_space<vmem>>, vector<4x64xf32>,
    %80 = vector.extract_strided_slice %72 {offsets = [0, 192], sizes = [4, 64], strides = [1, 1]} : vector<4x320xf32> to vector<4x64xf32>
    %c12 = arith.constant 12 : index
    %c0_37 = arith.constant 0 : index
    %81 = vector.load %arg6[%c12, %c0_37] : memref<20x64xf32, #tpu.memory_space<vmem>>, vector<4x64xf32>
    tpu.vector_store %arg6[%c12, %c0_37], %80 {strides = array<i32>} : memref<20x64xf32, #tpu.memory_space<vmem>>, vector<4x64xf32>,
    %82 = vector.extract_strided_slice %72 {offsets = [0, 256], sizes = [4, 64], strides = [1, 1]} : vector<4x320xf32> to vector<4x64xf32>
    %c16 = arith.constant 16 : index
    %c0_38 = arith.constant 0 : index
    %83 = vector.load %arg6[%c16, %c0_38] : memref<20x64xf32, #tpu.memory_space<vmem>>, vector<4x64xf32>
    tpu.vector_store %arg6[%c16, %c0_38], %82 {strides = array<i32>} : memref<20x64xf32, #tpu.memory_space<vmem>>, vector<4x64xf32>,
    %c0_39 = arith.constant 0 : index
    %c0_40 = arith.constant 0 : index
    %84 = vector.load %arg6[%c0_39, %c0_40] : memref<20x64xf32, #tpu.memory_space<vmem>>, vector<20x64xf32>
    %c0_41 = arith.constant 0 : index
    %c768 = arith.constant 768 : index
    %85 = vector.load %arg1[%c0_41, %c768] : memref<64x1152xf32, #tpu.memory_space<vmem>>, vector<64x64xf32>
    %cst_42 = arith.constant dense<0.000000e+00> : vector<20x64xf32>
    %86 = tpu.matmul %84, %85, %cst_42 {dimension_numbers = #tpu.dot_dimension_numbers<[1], [0], [0], [1], [0, 0, 1, 1], [], []>} : vector<20x64xf32>, vector<64x64xf32>, vector<20x64xf32> -> vector<20x64xf32>
    %c8_43 = arith.constant 8 : index
    %c0_44 = arith.constant 0 : index
    %87 = vector.load %arg2[%c8_43, %c0_44] : memref<16x384xf32, #tpu.memory_space<vmem>>, vector<1x64xf32>
    %88 = vector.broadcast %87 : vector<1x64xf32> to vector<20x64xf32>
    %89 = arith.addf %86, %88 : vector<20x64xf32>
    %cst_45 = arith.constant dense<0.000000e+00> : vector<20xf32>
    %90 = vector.multi_reduction <add>, %89, %cst_45 [1] : vector<20x64xf32> to vector<20xf32>
    %91 = vector.shape_cast %90 : vector<20xf32> to vector<20x1xf32>
    %cst_46 = arith.constant 6.400000e+01 : f32
    %92 = vector.broadcast %cst_46 : f32 to vector<20x1xf32>
    %93 = arith.divf %91, %92 : vector<20x1xf32>
    %94 = vector.broadcast %93 : vector<20x1xf32> to vector<20x64xf32>
    %95 = arith.subf %89, %94 : vector<20x64xf32>
    %96 = arith.mulf %95, %95 : vector<20x64xf32>
    %cst_47 = arith.constant dense<0.000000e+00> : vector<20xf32>
    %97 = vector.multi_reduction <add>, %96, %cst_47 [1] : vector<20x64xf32> to vector<20xf32>
    %98 = vector.shape_cast %97 : vector<20xf32> to vector<20x1xf32>
    %cst_48 = arith.constant 6.400000e+01 : f32
    %99 = vector.broadcast %cst_48 : f32 to vector<20x1xf32>
    %100 = arith.divf %98, %99 : vector<20x1xf32>
    %101 = vector.broadcast %93 : vector<20x1xf32> to vector<20x64xf32>
    %102 = arith.subf %89, %101 : vector<20x64xf32>
    %cst_49 = arith.constant 9.99999974E-6 : f32
    %103 = vector.broadcast %cst_49 : f32 to vector<20x1xf32>
    %104 = arith.addf %100, %103 : vector<20x1xf32>
    %105 = math.rsqrt %104 : vector<20x1xf32>
    %106 = vector.broadcast %105 : vector<20x1xf32> to vector<20x64xf32>
    %107 = arith.mulf %102, %106 : vector<20x64xf32>
    %c9 = arith.constant 9 : index
    %c0_50 = arith.constant 0 : index
    %108 = vector.load %arg2[%c9, %c0_50] : memref<16x384xf32, #tpu.memory_space<vmem>>, vector<1x64xf32>
    %109 = vector.broadcast %108 : vector<1x64xf32> to vector<20x64xf32>
    %110 = arith.mulf %107, %109 : vector<20x64xf32>
    %c10 = arith.constant 10 : index
    %c0_51 = arith.constant 0 : index
    %111 = vector.load %arg2[%c10, %c0_51] : memref<16x384xf32, #tpu.memory_space<vmem>>, vector<1x64xf32>
    %112 = vector.broadcast %111 : vector<1x64xf32> to vector<20x64xf32>
    %113 = arith.addf %110, %112 : vector<20x64xf32>
    %cst_52 = arith.constant 0.000000e+00 : f32
    %114 = vector.broadcast %cst_52 : f32 to vector<20x64xf32>
    %115 = arith.maximumf %113, %114 : vector<20x64xf32>
    %c0_53 = arith.constant 0 : index
    %c896 = arith.constant 896 : index
    %116 = vector.load %arg1[%c0_53, %c896] : memref<64x1152xf32, #tpu.memory_space<vmem>>, vector<64x32xf32>
    %cst_54 = arith.constant dense<0.000000e+00> : vector<20x32xf32>
    %117 = tpu.matmul %115, %116, %cst_54 {dimension_numbers = #tpu.dot_dimension_numbers<[1], [0], [0], [1], [0, 0, 1, 1], [], []>} : vector<20x64xf32>, vector<64x32xf32>, vector<20x32xf32> -> vector<20x32xf32>
    %c11 = arith.constant 11 : index
    %c0_55 = arith.constant 0 : index
    %118 = vector.load %arg2[%c11, %c0_55] : memref<16x384xf32, #tpu.memory_space<vmem>>, vector<1x32xf32>
    %119 = vector.broadcast %118 : vector<1x32xf32> to vector<20x32xf32>
    %120 = arith.addf %117, %119 : vector<20x32xf32>
    %121 = vector.extract_strided_slice %120 {offsets = [0, 0], sizes = [4, 32], strides = [1, 1]} : vector<20x32xf32> to vector<4x32xf32>
    %c0_56 = arith.constant 0 : index
    %c0_57 = arith.constant 0 : index
    %122 = vector.load %arg3[%c0_56, %c0_57] : memref<4x160xf32, #tpu.memory_space<vmem>>, vector<4x32xf32>
    tpu.vector_store %arg3[%c0_56, %c0_57], %121 {strides = array<i32>} : memref<4x160xf32, #tpu.memory_space<vmem>>, vector<4x32xf32>,
    %123 = vector.extract_strided_slice %120 {offsets = [4, 0], sizes = [4, 32], strides = [1, 1]} : vector<20x32xf32> to vector<4x32xf32>
    %c0_58 = arith.constant 0 : index
    %c32 = arith.constant 32 : index
    %124 = vector.load %arg3[%c0_58, %c32] : memref<4x160xf32, #tpu.memory_space<vmem>>, vector<4x32xf32>
    tpu.vector_store %arg3[%c0_58, %c32], %123 {strides = array<i32>} : memref<4x160xf32, #tpu.memory_space<vmem>>, vector<4x32xf32>,
    %125 = vector.extract_strided_slice %120 {offsets = [8, 0], sizes = [4, 32], strides = [1, 1]} : vector<20x32xf32> to vector<4x32xf32>
    %c0_59 = arith.constant 0 : index
    %c64 = arith.constant 64 : index
    %126 = vector.load %arg3[%c0_59, %c64] : memref<4x160xf32, #tpu.memory_space<vmem>>, vector<4x32xf32>
    tpu.vector_store %arg3[%c0_59, %c64], %125 {strides = array<i32>} : memref<4x160xf32, #tpu.memory_space<vmem>>, vector<4x32xf32>,
    %127 = vector.extract_strided_slice %120 {offsets = [12, 0], sizes = [4, 32], strides = [1, 1]} : vector<20x32xf32> to vector<4x32xf32>
    %c0_60 = arith.constant 0 : index
    %c96 = arith.constant 96 : index
    %128 = vector.load %arg3[%c0_60, %c96] : memref<4x160xf32, #tpu.memory_space<vmem>>, vector<4x32xf32>
    tpu.vector_store %arg3[%c0_60, %c96], %127 {strides = array<i32>} : memref<4x160xf32, #tpu.memory_space<vmem>>, vector<4x32xf32>,
    %129 = vector.extract_strided_slice %120 {offsets = [16, 0], sizes = [4, 32], strides = [1, 1]} : vector<20x32xf32> to vector<4x32xf32>
    %c0_61 = arith.constant 0 : index
    %c128_62 = arith.constant 128 : index
    %130 = vector.load %arg3[%c0_61, %c128_62] : memref<4x160xf32, #tpu.memory_space<vmem>>, vector<4x32xf32>
    tpu.vector_store %arg3[%c0_61, %c128_62], %129 {strides = array<i32>} : memref<4x160xf32, #tpu.memory_space<vmem>>, vector<4x32xf32>,
    %c0_63 = arith.constant 0 : index
    %c1024 = arith.constant 1024 : index
    %131 = vector.load %arg1[%c0_63, %c1024] : memref<64x1152xf32, #tpu.memory_space<vmem>>, vector<64x32xf32>
    %cst_64 = arith.constant dense<0.000000e+00> : vector<20x32xf32>
    %132 = tpu.matmul %84, %131, %cst_64 {dimension_numbers = #tpu.dot_dimension_numbers<[1], [0], [0], [1], [0, 0, 1, 1], [], []>} : vector<20x64xf32>, vector<64x32xf32>, vector<20x32xf32> -> vector<20x32xf32>
    %c12_65 = arith.constant 12 : index
    %c0_66 = arith.constant 0 : index
    %133 = vector.load %arg2[%c12_65, %c0_66] : memref<16x384xf32, #tpu.memory_space<vmem>>, vector<1x32xf32>
    %134 = vector.broadcast %133 : vector<1x32xf32> to vector<20x32xf32>
    %135 = arith.addf %132, %134 : vector<20x32xf32>
    %cst_67 = arith.constant 0.000000e+00 : f32
    %136 = vector.broadcast %cst_67 : f32 to vector<20x32xf32>
    %137 = arith.maximumf %135, %136 : vector<20x32xf32>
    %c13 = arith.constant 13 : index
    %c0_68 = arith.constant 0 : index
    %138 = vector.load %arg2[%c13, %c0_68] : memref<16x384xf32, #tpu.memory_space<vmem>>, vector<1x32xf32>
    %139 = vector.broadcast %138 : vector<1x32xf32> to vector<20x32xf32>
    %140 = arith.mulf %137, %139 : vector<20x32xf32>
    %cst_69 = arith.constant dense<0.000000e+00> : vector<20xf32>
    %141 = vector.multi_reduction <add>, %140, %cst_69 [1] : vector<20x32xf32> to vector<20xf32>
    %142 = vector.shape_cast %141 : vector<20xf32> to vector<20x1xf32>
    %c14 = arith.constant 14 : index
    %c0_70 = arith.constant 0 : index
    %143 = vector.load %arg2[%c14, %c0_70] : memref<16x384xf32, #tpu.memory_space<vmem>>, vector<1x1xf32>
    %144 = vector.broadcast %143 : vector<1x1xf32> to vector<20x1xf32>
    %145 = arith.addf %142, %144 : vector<20x1xf32>
    %146 = arith.negf %145 : vector<20x1xf32>
    %147 = math.exp %146 : vector<20x1xf32>
    %cst_71 = arith.constant 1.000000e+00 : f32
    %148 = vector.broadcast %cst_71 : f32 to vector<20x1xf32>
    %149 = arith.addf %148, %147 : vector<20x1xf32>
    %150 = arith.divf %148, %149 : vector<20x1xf32>
    %151 = tpu.iota {dimensions = array<i32: 1>} : vector<4x128xi32>
    %cst_72 = arith.constant 0.000000e+00 : f32
    %152 = vector.broadcast %cst_72 : f32 to vector<4x128xf32>
    %c0_i32 = arith.constant 0 : i32
    %153 = vector.broadcast %c0_i32 : i32 to vector<4x128xi32>
    %154 = arith.cmpi eq, %151, %153 : vector<4x128xi32>
    %155 = vector.extract_strided_slice %150 {offsets = [0, 0], sizes = [4, 1], strides = [1, 1]} : vector<20x1xf32> to vector<4x1xf32>
    %156 = vector.shape_cast %155 : vector<4x1xf32> to vector<4x1xf32>
    %157 = vector.broadcast %156 : vector<4x1xf32> to vector<4x128xf32>
    %158 = arith.select %154, %157, %152 : vector<4x128xi1>, vector<4x128xf32>
    %c1_i32 = arith.constant 1 : i32
    %159 = vector.broadcast %c1_i32 : i32 to vector<4x128xi32>
    %160 = arith.cmpi eq, %151, %159 : vector<4x128xi32>
    %161 = vector.extract_strided_slice %150 {offsets = [4, 0], sizes = [4, 1], strides = [1, 1]} : vector<20x1xf32> to vector<4x1xf32>
    %162 = vector.shape_cast %161 : vector<4x1xf32> to vector<4x1xf32>
    %163 = vector.broadcast %162 : vector<4x1xf32> to vector<4x128xf32>
    %164 = arith.select %160, %163, %158 : vector<4x128xi1>, vector<4x128xf32>
    %c2_i32 = arith.constant 2 : i32
    %165 = vector.broadcast %c2_i32 : i32 to vector<4x128xi32>
    %166 = arith.cmpi eq, %151, %165 : vector<4x128xi32>
    %167 = vector.extract_strided_slice %150 {offsets = [8, 0], sizes = [4, 1], strides = [1, 1]} : vector<20x1xf32> to vector<4x1xf32>
    %168 = vector.shape_cast %167 : vector<4x1xf32> to vector<4x1xf32>
    %169 = vector.broadcast %168 : vector<4x1xf32> to vector<4x128xf32>
    %170 = arith.select %166, %169, %164 : vector<4x128xi1>, vector<4x128xf32>
    %c3_i32 = arith.constant 3 : i32
    %171 = vector.broadcast %c3_i32 : i32 to vector<4x128xi32>
    %172 = arith.cmpi eq, %151, %171 : vector<4x128xi32>
    %173 = vector.extract_strided_slice %150 {offsets = [12, 0], sizes = [4, 1], strides = [1, 1]} : vector<20x1xf32> to vector<4x1xf32>
    %174 = vector.shape_cast %173 : vector<4x1xf32> to vector<4x1xf32>
    %175 = vector.broadcast %174 : vector<4x1xf32> to vector<4x128xf32>
    %176 = arith.select %172, %175, %170 : vector<4x128xi1>, vector<4x128xf32>
    %c4_i32 = arith.constant 4 : i32
    %177 = vector.broadcast %c4_i32 : i32 to vector<4x128xi32>
    %178 = arith.cmpi eq, %151, %177 : vector<4x128xi32>
    %179 = vector.extract_strided_slice %150 {offsets = [16, 0], sizes = [4, 1], strides = [1, 1]} : vector<20x1xf32> to vector<4x1xf32>
    %180 = vector.shape_cast %179 : vector<4x1xf32> to vector<4x1xf32>
    %181 = vector.broadcast %180 : vector<4x1xf32> to vector<4x128xf32>
    %182 = arith.select %178, %181, %176 : vector<4x128xi1>, vector<4x128xf32>
    %cst_73 = arith.constant dense<0.000000e+00> : vector<4xf32>
    %183 = vector.multi_reduction <add>, %182, %cst_73 [1] : vector<4x128xf32> to vector<4xf32>
    %184 = vector.shape_cast %183 : vector<4xf32> to vector<4x1xf32>
    %185 = vector.broadcast %184 : vector<4x1xf32> to vector<4x128xf32>
    %186 = arith.divf %182, %185 : vector<4x128xf32>
    %c0_74 = arith.constant 0 : index
    %c0_75 = arith.constant 0 : index
    %187 = vector.load %arg4[%c0_74, %c0_75] : memref<4x128xf32, #tpu.memory_space<vmem>>, vector<4x128xf32>
    tpu.vector_store %arg4[%c0_74, %c0_75], %186 {strides = array<i32>} : memref<4x128xf32, #tpu.memory_space<vmem>>, vector<4x128xf32>,
    return
  }
}

</mosaic_0001>

<bundles_post_ra>
// kernel: scenario_generator_forward.1
= control target key start
LH: loop header
LB: loop body
LE: loop exit
PB: predicated region body
PF: predicated region fallthrough
CT: control target
= control target key end

     0   :  { %11 = vsyncpa [#allocation4], 0  ;;  %s1578_s0 = inlined_call_operand.hbm [shape: f32[4,32], index: 0, kind: input, shape index: {}]   ;;  %s1579_s1 = inlined_call_operand.hbm [shape: f32[64,1152], index: 1, kind: input, shape index: {}]   ;;  %s1580_s2 = inlined_call_operand.hbm [shape: f32[16,384], index: 2, kind: input, shape index: {}]   ;;  %s1581_s3 = inlined_call_operand.vmem [shape: f32[4,160], index: 3, kind: output, shape index: {0}]   ;;  %s1582_s4 = inlined_call_operand.hbm [shape: f32[4,128], index: 4, kind: output, shape index: {1}]   ;;  %s1583_s5 = inlined_call_operand.vmem [shape: f32[4,320], index: 5, kind: output, shape index: {2}]  }
   0x1   :  { %12 = vsyncpa [#allocation7], 0 }
   0x2   :  { %13 = vsyncpa [#allocation5], 0  ;;  %s1362_s18 = smov [#allocation6]  }
   0x3   :  { %s29_s19 = sshll.u32 %s1362_s18, 4  ;;  %s30_s19 = int_to_ptr.vmem [resolvable:$true] %s29_s19 }
   0x4   :  { %s1284_s20 = scalar_lea.vmem %s30_s19, 9216  ;;  %p1289_p1 = scmp.lt.s32.totalorder %s30_s19, %s30_s19 }
   0x5   :  { %p1285_p0 = scmp.ne.s32.totalorder %s30_s19, %s1284_s20  ;;  %p1290_p2 = scmp.lt.s32.totalorder %s1284_s20, %s1284_s20 }
   0x7   :  { %p1291_p3 = por %p1290_p2, %p1289_p1 }
   0x9   :  { %p1292_p4 = pnand %p1291_p3, %p1285_p0 }
   0xb   :  { %1295 = shalt.err (!%p1292_p4)
}
   0xc   :  { %s1363_s21 = smov 1152   ;;  %s1364_s22 = smov 72  }
   0xd   :  { %35 = dma.hbm_to_vmem [thread:$0]  %s1579_s1, 9216, %s30_s19, [#allocation7], %s1363_s21, %s1363_s21, %s1364_s22  }
   0xe   :  { %s1365_s25 = smov [#allocation3]   ;;  %s1366_s27 = smov [#allocation8]  }
   0xf   :  { %s20_s26 = sshll.u32 %s1365_s25, 4  ;;  %s41_s28 = sshll.u32 %s1366_s27, 4  ;;  %s21_s26 = int_to_ptr.vmem [resolvable:$true] %s20_s26  ;;  %s42_s28 = int_to_ptr.vmem [resolvable:$true] %s41_s28 }
  0x10   :  { %s1304_s29 = scalar_lea.vmem %s21_s26, 64  ;;  %p1309_p6 = scmp.lt.s32.totalorder %s21_s26, %s21_s26 }
  0x11   :  { %p1305_p5 = scmp.ne.s32.totalorder %s21_s26, %s1304_s29  ;;  %p1310_p7 = scmp.lt.s32.totalorder %s1304_s29, %s1304_s29 }
  0x13   :  { %p1311_p8 = por %p1310_p7, %p1309_p6 }
  0x15   :  { %p1312_p9 = pnand %p1311_p8, %p1305_p5 }
  0x17   :  { %1315 = shalt.err (!%p1312_p9)
}
  0x18   :  { %23 = dma.hbm_to_vmem [thread:$0]  %s1578_s0, 64, %s21_s26, [#allocation4]  }
  0x19   :  { %s1324_s7 = scalar_lea.vmem %s42_s28, 768  ;;  %p1329_p11 = scmp.lt.s32.totalorder %s42_s28, %s42_s28 }
  0x1a   :  { %p1325_p10 = scmp.ne.s32.totalorder %s42_s28, %s1324_s7  ;;  %p1330_p12 = scmp.lt.s32.totalorder %s1324_s7, %s1324_s7 }
  0x1c   :  { %p1331_p13 = por %p1330_p12, %p1329_p11 }
  0x1e   :  { %p1332_p0 = pnand %p1331_p13, %p1325_p10 }
  0x20   :  { %1335 = shalt.err (!%p1332_p0)
}
  0x21   :  { %s1367_s1 = smov 384   ;;  %s1368_s8 = smov 24  }
  0x22   :  { %47 = dma.hbm_to_vmem [thread:$0]  %s1580_s2, 768, %s42_s28, [#allocation7], %s1367_s1, %s1367_s1, %s1368_s8  }
  0x23   :  { %1356 = dma.done.wait [#allocation4], 64  }
  0x24   :  { %1357 = vsyncadd [#allocation4], 4294967232 }
  0x25   :  { %1358 = dma.done.wait [#allocation7], 9984  }
  0x26   :  { %1359 = vsyncadd [#allocation7], 4294957312  ;;  %v1369_v0 = vmov 0.0   ;;  %vm1370_vm0 = vmmov 0   ;;  %v61_v1 = vld [vmem:[#allocation6 + $0xd8] sm:$0xff]  ;;  %v60_v2 = vld [vmem:[#allocation6 + $0x90] sm:$0xff] }
  0x27   :  { %1093 = vmatprep.subr.mxu0 %v1369_v0  ;;  %1101 = vmatprep.mubr.msk.f32.mxu0 %vm1370_vm0, %v1369_v0  ;;  %v59_v3 = vld [vmem:[#allocation6 + $0x48] sm:$0xff]  ;;  %v58_v4 = vld [vmem:[#allocation6] sm:$0xff]  ;;  %v57_v5 = vld [vmem:[#allocation3] sm:$0xf]  ;;  %vm63_vm1 = vcmask 261120   ;;  %vm137_vm2 = vcmask 519168  }
  0x28   :  { %1104 = vmatprep.subr.mxu1 %v1369_v0  ;;  %1120 = vmatprep.mubr.msk.f32.mxu1 %vm1370_vm0, %v1369_v0  ;;  %v62_v6 = vld [vmem:[#allocation8] ss:$0 sm:$0xff]  ;;  %v163_v17 = vld [vmem:[#allocation6 + $0x1b8] sm:$0xff]  ;;  %v162_v18 = vld [vmem:[#allocation6 + $0x170] sm:$0xff]  ;;  %vm166_vm3 = vcmask 523264   ;;  %s1371_s11 = smov 64  }
  0x29   :  { %1094 = vmatpush3.msra.mxu0 %v61_v1  ;;  %v164_v16 = vld [vmem:[#allocation6 + $0x200] sm:$0xff]  ;;  %v161_v19 = vld [vmem:[#allocation6 + $0x128] sm:$0xff]  ;;  %v159_v21 = vld [vmem:[#allocation6 + $0x98] sm:$0xff]  ;;  %vm792_vm4 = vcmask 257024   ;;  %vm980_vm10 = vcmask 1043456   ;;  %s1373_s15 = smov 32  }
  0x2a   :  { %1095 = vmatprep.subr.mxu0 %v1369_v0  ;;  %1105 = vmatpush3.msra.mxu1 %v164_v16  ;;  %v160_v20 = vld [vmem:[#allocation6 + $0xe0] sm:$0xff]  ;;  %v158_v22 = vld [vmem:[#allocation6 + $0x50] sm:$0xff]  ;;  %v157_v23 = vld [vmem:[#allocation6 + $0x8] sm:$0xff]  ;;  %s1374_s18 = smov 96   ;;  %s1375_s19 = smov [#allocation9]   ;;  %vm799_vm11 = vcmask 519424  }
  0x2b   :  { %1096 = vmatpush3.msra.mxu0 %v60_v2  ;;  %1106 = vmatprep.subr.mxu1 %v1369_v0  ;;  %v247_v24 = vld [vmem:[#allocation6 + $0x208] sm:$0xff]  ;;  %v246_v25 = vld [vmem:[#allocation6 + $0x1c0] sm:$0xff]  ;;  %v245_v26 = vld [vmem:[#allocation6 + $0x178] sm:$0xff]  ;;  %s995_s20 = sshll.u32 %s1375_s19, 4  ;;  %s996_s20 = int_to_ptr.vmem [resolvable:$true] %s995_s20 }
  0x2c   :  { %1097 = vmatprep.subr.mxu0 %v1369_v0  ;;  %1107 = vmatpush3.msra.mxu1 %v163_v17  ;;  %v244_v27 = vld [vmem:[#allocation6 + $0x130] sm:$0xff]  ;;  %v243_v28 = vld [vmem:[#allocation6 + $0xe8] sm:$0xff]  ;;  %v242_v29 = vld [vmem:[#allocation6 + $0xa0] sm:$0xff]  ;;  %s1336_s21 = scalar_lea.vmem %s996_s20, 64  ;;  %p1341_p2 = scmp.lt.s32.totalorder %s996_s20, %s996_s20 }
  0x2d   :  { %1098 = vmatpush3.msra.mxu0 %v59_v3  ;;  %1108 = vmatprep.subr.mxu1 %v1369_v0  ;;  %v152_v34 = vld [vmem:[#allocation8 + $0x1] ss:$0 sm:$0xff]  ;;  %v154_v36 = vld [vmem:[#allocation8 + $0x2] ss:$0 sm:$0xff]  ;;  %v241_v40 = vld [vmem:[#allocation6 + $0x58] sm:$0xff]  ;;  %p1337_p1 = scmp.ne.s32.totalorder %s996_s20, %s1336_s21  ;;  %p1342_p3 = scmp.lt.s32.totalorder %s1336_s21, %s1336_s21 }
  0x2e   :  { %1099 = vmatprep.subr.mxu0 %v1369_v0  ;;  %1109 = vmatpush3.msra.mxu1 %v162_v18  ;;  %v240_v41 = vld [vmem:[#allocation6 + $0x10] sm:$0xff]  ;;  %v165_v42 = vld [vmem:[#allocation8 + $0x3] ss:$0 sm:$0xff]  ;;  %v248_v46 = vld [vmem:[#allocation8 + $0x4] ss:$0 sm:$0xff] }
  0x2f   :  { %1100 = vmatpush3.msra.mxu0 %v58_v4  ;;  %1110 = vmatprep.subr.mxu1 %v1369_v0  ;;  %v362_v56 = vld [vmem:[#allocation6 + $0x218] sm:$0xff]  ;;  %v361_v57 = vld [vmem:[#allocation6 + $0x210] sm:$0xff]  ;;  %v363_v58 = vld [vmem:[#allocation6 + $0x220] sm:$0xff]  ;;  %p1343_p4 = por %p1342_p3, %p1341_p2 }
  0x30   :  { %1102 = vmatmul.mubr.msk.f32.vlgmr.msra.gmra.mxu0 %vm63_vm1, %v57_v5  ;;  %1123 = vmatprep.subr.mxu0 %v1369_v0  ;;  %v359_v59 = vld [vmem:[#allocation6 + $0x1d0] sm:$0xff]  ;;  %v358_v60 = vld [vmem:[#allocation6 + $0x1c8] sm:$0xff]  ;;  %v360_v61 = vld [vmem:[#allocation6 + $0x1d8] sm:$0xff] }
  0x31   :  { %1139 = vmatprep.mubr.msk.f32.mxu0 %vm1370_vm0, %v1369_v0  ;;  %1111 = vmatpush3.msra.mxu1 %v161_v19  ;;  %v356_v62 = vld [vmem:[#allocation6 + $0x188] sm:$0xff]  ;;  %v355_v63 = vld [vmem:[#allocation6 + $0x180] sm:$0xff]  ;;  %v357_v1 = vld [vmem:[#allocation6 + $0x190] sm:$0xff]  ;;  %p1344_p5 = pnand %p1343_p4, %p1337_p1 }
  0x32   :  { %1112 = vmatprep.subr.mxu1 %v1369_v0  ;;  %1124 = vmatpush3.msra.mxu0 %v247_v24  ;;  %v353_v2 = vld [vmem:[#allocation6 + $0x140] sm:$0xff]  ;;  %v352_v3 = vld [vmem:[#allocation6 + $0x138] sm:$0xff]  ;;  %v354_v4 = vld [vmem:[#allocation6 + $0x148] sm:$0xff] }
  0x33   :  { %1113 = vmatpush3.msra.mxu1 %v160_v20  ;;  %1125 = vmatprep.subr.mxu0 %v1369_v0  ;;  %v350_v5 = vld [vmem:[#allocation6 + $0xf8] sm:$0xff]  ;;  %v342_v16 = vld [vmem:[#allocation6 + $0x28] sm:$0xff] }
  0x34   :  { %1114 = vmatprep.subr.mxu1 %v1369_v0  ;;  %1126 = vmatpush3.msra.mxu0 %v246_v25 }
  0x35   :  { %1115 = vmatpush3.msra.mxu1 %v159_v21  ;;  %1127 = vmatprep.subr.mxu0 %v1369_v0  ;;  %v335_v21 = vld [vmem:[#allocation8 + $0x5] ss:$0 sm:$0xff] }
  0x36   :  { %1116 = vmatprep.subr.mxu1 %v1369_v0  ;;  %1128 = vmatpush3.msra.mxu0 %v245_v26 }
  0x37   :  { %1117 = vmatpush3.msra.mxu1 %v158_v22  ;;  %1129 = vmatprep.subr.mxu0 %v1369_v0 }
  0x38   :  { %1118 = vmatprep.subr.mxu1 %v1369_v0  ;;  %1130 = vmatpush3.msra.mxu0 %v244_v27  ;;  %v553_v27 = vld [vmem:[#allocation6 + $0x228] sm:$0xff] }
  0x39   :  { %1119 = vmatpush3.msra.mxu1 %v157_v23  ;;  %1131 = vmatprep.subr.mxu0 %v1369_v0  ;;  %v337_v23 = vld [vmem:[#allocation8 + $0x6] ss:$0 sm:$0xff] }
  0x3a   :  { %1132 = vmatpush3.msra.mxu0 %v243_v28  ;;  %401 = vmatprep.subr.mxu1 %v362_v56  ;;  %v552_v28 = vld [vmem:[#allocation6 + $0x1e0] sm:$0xff]  ;;  %v820_v56 = vld [vmem:[#allocation6 + $0x1f0] sm:$0xff] }
  0x3b   :  { %1133 = vmatprep.subr.mxu0 %v1369_v0 }
  0x3c   :  { %1134 = vmatpush3.msra.mxu0 %v242_v29  ;;  %v551_v29 = vld [vmem:[#allocation6 + $0x198] sm:$0xff] }
  0x3d   :  { %1135 = vmatprep.subr.mxu0 %v1369_v0 }
  0x3e   :  { %1136 = vmatpush3.msra.mxu0 %v241_v40 }
  0x3f   :  { %1137 = vmatprep.subr.mxu0 %v1369_v0 }
  0x40   :  { %1138 = vmatpush3.msra.mxu0 %v240_v41 }
  0x41   :  { %1142 = vmatprep.subr.mxu0 %v1369_v0 }
  0xf0   :  { %v133_v7 = vpop.f32.mrf.mxu0 }
  0xf1   :  { %v134_v8 = vadd.f32 %v133_v7, %v62_v6  ;;  %v349_v6 = vld [vmem:[#allocation6 + $0xf0] sm:$0xff]  ;;  %v351_v7 = vld [vmem:[#allocation6 + $0x100] sm:$0xff] }
  0xf2   :  { %v1103_v9 = vpop.f32.mrf.mxu0 }
  0xf3   :  { %v138_v10 = vsel %vm137_vm2, %v134_v8, 0.0  ;;  %v346_v9 = vld [vmem:[#allocation6 + $0xa8] sm:$0xff] }
  0xf4   :  { %139 = vadd.xlane.f32.xlu0 %v138_v10  ;;  %v348_v10 = vld [vmem:[#allocation6 + $0xb8] sm:$0xff] }
 0x17d   :  { %v140_v11 = vpop.xlane.xlu0 %139 }
 0x17e   :  { %v142_v12 = vmul.f32 0.015625, %v140_v11  ;;  %v344_v11 = vld [vmem:[#allocation6 + $0x68] sm:$0xff] }
 0x180   :  { %v143_v13 = vsub.f32 %v134_v8, %v142_v12  ;;  %v347_v8 = vld [vmem:[#allocation6 + $0xb0] sm:$0xff]  ;;  %v343_v12 = vld [vmem:[#allocation6 + $0x60] sm:$0xff] }
 0x182   :  { %v144_v14 = vmul.f32 %v143_v13, %v143_v13 }
 0x184   :  { %v145_v15 = vsel %vm137_vm2, %v144_v14, 0.0  ;;  %v341_v14 = vld [vmem:[#allocation6 + $0x20] sm:$0xff] }
 0x185   :  { %146 = vadd.xlane.f32.xlu0 %v145_v15  ;;  %v340_v15 = vld [vmem:[#allocation6 + $0x18] sm:$0xff] }
 0x20e   :  { %v147_v30 = vpop.xlane.xlu0 %146 }
 0x20f   :  { %v148_v31 = vmul.f32 0.015625, %v147_v30  ;;  %v550_v30 = vld [vmem:[#allocation6 + $0x150] sm:$0xff] }
 0x211   :  { %v149_v32 = vadd.f32 1e-05, %v148_v31  ;;  %v367_v31 = vlaneseq }
 0x213   :  { %1252 = vrsqrt.f32 %v149_v32  ;;  %v368_v32 = vshrl.u32 %v367_v31, 7 }
 0x215   :  { %v373_v40 = vsub.s32 1, %v368_v32 }
 0x220   :  { %v1253_v33 = vpop.eup %1252 }
 0x221   :  { %v151_v35 = vmul.f32 %v1253_v33, %v143_v13  ;;  %v345_v13 = vld [vmem:[#allocation6 + $0x70] sm:$0xff]  ;;  %v549_v33 = vld [vmem:[#allocation6 + $0x108] sm:$0xff] }
 0x223   :  { %v153_v37 = vmul.f32 %v152_v34, %v151_v35  ;;  %v548_v34 = vld [vmem:[#allocation6 + $0xc0] sm:$0xff]  ;;  %v547_v35 = vld [vmem:[#allocation6 + $0x78] sm:$0xff] }
 0x225   :  { %v155_v38 = vadd.f32 %v154_v36, %v153_v37  ;;  %v369_v36 = vsub.s32 0, %v368_v32  ;;  %v377_v37 = vsub.s32 2, %v368_v32 }
 0x227   :  { %v156_v39 = vmax.f32 %v155_v38, 0.0  ;;  %v546_v38 = vld [vmem:[#allocation6 + $0x30] sm:$0xff] }
 0x229   :  { %1121 = vmatmul.mubr.msk.f32.vlgmr.msra.gmra.mxu1 %vm166_vm3, %v156_v39  ;;  %v365_v39 = vld [vmem:[#allocation8 + $0x7] ss:$8 sm:$0x7] }
 0x22a   :  { %449 = vmatprep.mubr.f32.mxu1 %v1369_v0  ;;  %402 = vmatpush1.msra.mxu1 %v361_v57  ;;  %v370_v41 = vrot.slane %v365_v39, %v369_v36  ;;  %v819_v57 = vld [vmem:[#allocation6 + $0x1a8] sm:$0xff] }
 0x22b   :  { %403 = vmatprep.subr.mxu1 %v359_v59  ;;  %v818_v59 = vld [vmem:[#allocation6 + $0x160] sm:$0xff] }
 0x22c   :  { %404 = vmatpush1.msra.mxu1 %v358_v60  ;;  %v817_v60 = vld [vmem:[#allocation6 + $0x118] sm:$0xff] }
 0x22d   :  { %405 = vmatprep.subr.mxu1 %v356_v62  ;;  %v816_v62 = vld [vmem:[#allocation6 + $0xd0] sm:$0xff] }
 0x22e   :  { %406 = vmatpush1.msra.mxu1 %v355_v63  ;;  %v815_v63 = vld [vmem:[#allocation6 + $0x88] sm:$0xff] }
 0x22f   :  { %407 = vmatprep.subr.mxu1 %v353_v2  ;;  %v554_v2 = vld [vmem:[#allocation8 + $0x18] ss:$0 sm:$0xff] }
 0x230   :  { %408 = vmatpush1.msra.mxu1 %v352_v3 }
 0x231   :  { %409 = vmatprep.subr.mxu1 %v350_v5 }
 0x232   :  { %410 = vmatpush1.msra.mxu1 %v349_v6 }
 0x233   :  { %411 = vmatprep.subr.mxu1 %v347_v8 }
 0x234   :  { %412 = vmatpush1.msra.mxu1 %v346_v9 }
 0x235   :  { %413 = vmatprep.subr.mxu1 %v344_v11 }
 0x236   :  { %414 = vmatpush1.msra.mxu1 %v343_v12 }
 0x237   :  { %415 = vmatprep.subr.mxu1 %v341_v14 }
 0x238   :  { %416 = vmatpush1.msra.mxu1 %v340_v15 }
 0x239   :  { %1161 = vmatprep.subr.mxu1 %v1369_v0 }
 0x2e9   :  { %v236_v43 = vpop.f32.mrf.mxu1 }
 0x2ea   :  { %v237_v44 = vadd.f32 %v236_v43, %v165_v42  ;;  %v378_v42 = vrot.slane %v365_v39, %v377_v37  ;;  %v374_v43 = vrot.slane %v365_v39, %v373_v40 }
 0x2eb   :  { %v1122_v45 = vpop.f32.mrf.mxu1 }
 0x2ec   :  { %1140 = vmatmul.mubr.msk.f32.vlgmr.msra.gmra.mxu0 %vm166_vm3, %v237_v44 }
 0x2ed   :  { %1158 = vmatprep.mubr.msk.f32.mxu0 %vm1370_vm0, %v1369_v0  ;;  %1143 = vmatpush3.msra.mxu0 %v363_v58 }
 0x2ee   :  { %1144 = vmatprep.subr.mxu0 %v1369_v0 }
 0x2ef   :  { %1145 = vmatpush3.msra.mxu0 %v360_v61 }
 0x2f0   :  { %1146 = vmatprep.subr.mxu0 %v1369_v0 }
 0x2f1   :  { %1147 = vmatpush3.msra.mxu0 %v357_v1  ;;  %v814_v1 = vld [vmem:[#allocation6 + $0x40] sm:$0xff] }
 0x2f2   :  { %1148 = vmatprep.subr.mxu0 %v1369_v0 }
 0x2f3   :  { %1149 = vmatpush3.msra.mxu0 %v354_v4 }
 0x2f4   :  { %1150 = vmatprep.subr.mxu0 %v1369_v0 }
 0x2f5   :  { %1151 = vmatpush3.msra.mxu0 %v351_v7 }
 0x2f6   :  { %1152 = vmatprep.subr.mxu0 %v1369_v0 }
 0x2f7   :  { %1153 = vmatpush3.msra.mxu0 %v348_v10 }
 0x2f8   :  { %1154 = vmatprep.subr.mxu0 %v1369_v0 }
 0x2f9   :  { %1155 = vmatpush3.msra.mxu0 %v345_v13 }
 0x2fa   :  { %1156 = vmatprep.subr.mxu0 %v1369_v0 }
 0x2fb   :  { %1157 = vmatpush3.msra.mxu0 %v342_v16 }
 0x2fc   :  { %1186 = vmatprep.subr.mxu0 %v1369_v0 }
 0x3ac   :  { %v318_v47 = vpop.f32.mrf.mxu0 }
 0x3ad   :  { %v319_v48 = vadd.f32 %v318_v47, %v248_v46 }
 0x3ae   :  { %v1141_v49 = vpop.f32.mrf.mxu0 }
 0x3af   :  { %v322_v50 = vsel %vm137_vm2, %v319_v48, 0.0 }
 0x3b0   :  { %323 = vadd.xlane.f32.xlu1 %v322_v50 }
 0x439   :  { %v324_v51 = vpop.xlane.xlu1 %323 }
 0x43a   :  { %v325_v52 = vmul.f32 0.015625, %v324_v51 }
 0x43c   :  { %v1451_v53 = vsub.f32 %v319_v48, %v325_v52 }
 0x43e   :  { %v327_v54 = vmul.f32 %v1451_v53, %v1451_v53 }
 0x440   :  { %v328_v55 = vsel %vm137_vm2, %v327_v54, 0.0  ;;  %v821_v54 = vld [vmem:[#allocation6 + $0x238] sm:$0xff] }
 0x441   :  { %329 = vadd.xlane.f32.xlu1 %v328_v55 }
 0x4ca   :  { %v330_v17 = vpop.xlane.xlu1 %329 }
 0x4cb   :  { %v331_v18 = vmul.f32 0.015625, %v330_v17 }
 0x4cd   :  { %v332_v19 = vadd.f32 1e-05, %v331_v18 }
 0x4cf   :  { %1254 = vrsqrt.f32 %v332_v19 }
 0x4dc   :  { %v1255_v20 = vpop.eup %1254 }
 0x4dd   :  { %v334_v22 = vmul.f32 %v1255_v20, %v1451_v53 }
 0x4df   :  { %v336_v24 = vmul.f32 %v335_v21, %v334_v22  ;;  %v822_v21 = vld [vmem:[#allocation8 + $0x1c] ss:$0 sm:$0xff] }
 0x4e1   :  { %v338_v25 = vadd.f32 %v337_v23, %v336_v24 }
 0x4e3   :  { %v339_v26 = vmax.f32 %v338_v25, 0.0 }
 0x4e5   :  { %1014 = vmatmul.mubr.msk.f32.vlgmr.msra.gmra.mxu1 %vm166_vm3, %v339_v26  ;;  %1159 = vmatmul.mubr.msk.f32.vlgmr.msra.gmra.mxu0 %vm166_vm3, %v339_v26 }
 0x4e6   :  { %1177 = vmatprep.mubr.msk.f32.mxu1 %vm1370_vm0, %v1369_v0  ;;  %1202 = vmatprep.mubr.msk.f32.mxu0 %vm1370_vm0, %v1369_v0 }
 0x4e7   :  { %1162 = vmatpush3.msra.mxu1 %v553_v27 }
 0x4e8   :  { %1163 = vmatprep.subr.mxu1 %v1369_v0 }
 0x4e9   :  { %1164 = vmatpush3.msra.mxu1 %v552_v28 }
 0x4ea   :  { %1165 = vmatprep.subr.mxu1 %v1369_v0 }
 0x4eb   :  { %1166 = vmatpush3.msra.mxu1 %v551_v29 }
 0x4ec   :  { %1167 = vmatprep.subr.mxu1 %v1369_v0 }
 0x4ed   :  { %1168 = vmatpush3.msra.mxu1 %v550_v30 }
 0x4ee   :  { %1169 = vmatprep.subr.mxu1 %v1369_v0 }
 0x4ef   :  { %1170 = vmatpush3.msra.mxu1 %v549_v33 }
 0x4f0   :  { %1171 = vmatprep.subr.mxu1 %v1369_v0 }
 0x4f1   :  { %1172 = vmatpush3.msra.mxu1 %v548_v34 }
 0x4f2   :  { %1173 = vmatprep.subr.mxu1 %v1369_v0 }
 0x4f3   :  { %1174 = vmatpush3.msra.mxu1 %v547_v35  ;;  %v906_v35 = vld [vmem:[#allocation8 + $0x1d] ss:$0 sm:$0xff] }
 0x4f4   :  { %1175 = vmatprep.subr.mxu1 %v1369_v0 }
 0x4f5   :  { %1176 = vmatpush3.msra.mxu1 %v546_v38 }
 0x4f6   :  { %1211 = vmatprep.subr.mxu1 %v1369_v0 }
 0x5a5   :  { %v451_v44 = vpop.f32.mrf.mxu1  ;;  %v522_v45 = vpop.f32.mrf.mxu0 }
 0x5a6   :  { %v452_v46 = vadd.f32 %v451_v44, %v370_v41  ;;  %v523_v47 = vadd.f32 %v522_v45, %v378_v42 }
 0x5a7   :  { %v453_v48 = vpop.f32.mrf.mxu1  ;;  %v1160_v49 = vpop.f32.mrf.mxu0 }
 0x5a8   :  { %532 = vst.msk [vmem:[#allocation2] sm:$0xf] %vm137_vm2, %v452_v46  ;;  %531 = vst.msk [vmem:[%s1583_s5 + $0x8] sm:$0xf] %vm137_vm2, %v523_v47  ;;  %v454_v50 = vadd.f32 %v453_v48, %v374_v43  ;;  %533 = vrot.lane.b32.xlu0 %v452_v46, %s1371_s11 }
 0x5a9   :  { %542 = vst.msk [vmem:[#allocation2 + $0x10] sm:$0xf] %vm137_vm2, %v523_v47 }
 0x5aa   :  { %v528_v51 = vcombine.low %v452_v46, %v454_v50  ;;  %537 = vst.msk [vmem:[#allocation2 + $0x8] sm:$0xf] %vm137_vm2, %v454_v50  ;;  %538 = vrot.lane.b32.xlu1 %v454_v50, %s1371_s11 }
 0x5ac   :  { %530 = vst [vmem:[%s1583_s5] sm:$0xff] %v528_v51  ;;  %v701_v51 = vld [vmem:[#allocation6 + $0x230] sm:$0xff] }
 0x5ad   :  { %1187 = vmatpush3.msra.mxu0 %v701_v51 }
 0x5ae   :  { %1188 = vmatprep.subr.mxu0 %v1369_v0 }
 0x5b0   :  { %v545_v61 = vld [vmem:[#allocation2 + $0x10] sm:$0xf] }
 0x61a   :  { %v534_v52 = vpop.permute.xlu0 %533 }
 0x61b   :  { %536 = vst.msk [vmem:[#allocation2 + $0x4] sm:$0xf] %vm137_vm2, %v534_v52  ;;  %v700_v52 = vld [vmem:[#allocation6 + $0x1e8] sm:$0xff] }
 0x61c   :  { %v539_v53 = vpop.permute.xlu1 %538  ;;  %1189 = vmatpush3.msra.mxu0 %v700_v52 }
 0x61d   :  { %541 = vst.msk [vmem:[#allocation2 + $0xc] sm:$0xf] %vm137_vm2, %v539_v53  ;;  %1190 = vmatprep.subr.mxu0 %v1369_v0  ;;  %v699_v53 = vld [vmem:[#allocation6 + $0x1a0] sm:$0xff] }
 0x61e   :  { %1191 = vmatpush3.msra.mxu0 %v699_v53 }
 0x61f   :  { %1192 = vmatprep.subr.mxu0 %v1369_v0 }
 0x622   :  { %v543_v55 = vld [vmem:[#allocation2] sm:$0xff] }
 0x623   :  { %1178 = vmatmul.mubr.msk.f32.vlgmr.msra.gmra.mxu1 %vm166_vm3, %v543_v55 }
 0x624   :  { %1212 = vmatpush3.msra.mxu1 %v821_v54  ;;  %1180 = vmatprep.mubr.msk.f32.mxu1 %vm1370_vm0, %v1369_v0  ;;  %v544_v58 = vld [vmem:[#allocation2 + $0x8] sm:$0xff]  ;;  %v698_v54 = vld [vmem:[#allocation6 + $0x158] sm:$0xff] }
 0x625   :  { %1213 = vmatprep.subr.mxu1 %v1369_v0  ;;  %1193 = vmatpush3.msra.mxu0 %v698_v54 }
 0x626   :  { %1214 = vmatpush3.msra.mxu1 %v820_v56  ;;  %1194 = vmatprep.subr.mxu0 %v1369_v0  ;;  %v696_v56 = vld [vmem:[#allocation6 + $0xc8] sm:$0xff] }
 0x627   :  { %1215 = vmatprep.subr.mxu1 %v1369_v0  ;;  %1181 = vmatmul.mubr.msk.f32.gmra.mxu1 %vm166_vm3, %v544_v58 }
 0x628   :  { %1216 = vmatpush3.msra.mxu1 %v819_v57  ;;  %1183 = vmatprep.mubr.msk.f32.mxu1 %vm1370_vm0, %v1369_v0  ;;  %v695_v57 = vld [vmem:[#allocation6 + $0x80] sm:$0xff] }
 0x629   :  { %1217 = vmatprep.subr.mxu1 %v1369_v0 }
 0x62a   :  { %1218 = vmatpush3.msra.mxu1 %v818_v59  ;;  %v1372_v59 = vmov 0  }
 0x62b   :  { %1219 = vmatprep.subr.mxu1 %v1369_v0  ;;  %1184 = vmatmul.mubr.msk.f32.gmra.mxu1 %vm166_vm3, %v545_v61 }
 0x62c   :  { %1220 = vmatpush3.msra.mxu1 %v817_v60  ;;  %1227 = vmatprep.mubr.msk.f32.mxu1 %vm1370_vm0, %v1369_v0 }
 0x62d   :  { %1221 = vmatprep.subr.mxu1 %v1369_v0  ;;  %1250 = vset.pattern.permute.xlu1 %v1372_v59 }
 0x62e   :  { %1222 = vmatpush3.msra.mxu1 %v816_v62  ;;  %1251 = vset.pattern.permute.xlu0 %v1372_v59 }
 0x62f   :  { %1223 = vmatprep.subr.mxu1 %v1369_v0 }
 0x630   :  { %1224 = vmatpush3.msra.mxu1 %v815_v63 }
 0x631   :  { %1225 = vmatprep.subr.mxu1 %v1369_v0 }
 0x632   :  { %1226 = vmatpush3.msra.mxu1 %v814_v1 }
 0x633   :  { %1228 = vmatmul.mubr.msk.f32.vlgmr.msra.gmra.mxu1 %vm166_vm3, %v543_v55  ;;  %v697_v55 = vld [vmem:[#allocation6 + $0x110] sm:$0xff] }
 0x634   :  { %1230 = vmatprep.mubr.msk.f32.mxu1 %vm1370_vm0, %v1369_v0  ;;  %1195 = vmatpush3.msra.mxu0 %v697_v55 }
 0x635   :  { %1196 = vmatprep.subr.mxu0 %v1369_v0 }
 0x636   :  { %1197 = vmatpush3.msra.mxu0 %v696_v56 }
 0x637   :  { %1231 = vmatmul.mubr.msk.f32.gmra.mxu1 %vm166_vm3, %v544_v58  ;;  %1198 = vmatprep.subr.mxu0 %v1369_v0  ;;  %v694_v58 = vld [vmem:[#allocation6 + $0x38] sm:$0xff] }
 0x638   :  { %1233 = vmatprep.mubr.msk.f32.mxu1 %vm1370_vm0, %v1369_v0  ;;  %1199 = vmatpush3.msra.mxu0 %v695_v57 }
 0x639   :  { %1200 = vmatprep.subr.mxu0 %v1369_v0 }
 0x63a   :  { %1201 = vmatpush3.msra.mxu0 %v694_v58 }
 0x63b   :  { %1234 = vmatmul.mubr.msk.f32.gmra.mxu1 %vm166_vm3, %v545_v61 }
 0x6e3   :  { %v630_v3 = vpop.f32.mrf.mxu1 }
 0x6e4   :  { %v631_v4 = vadd.f32 %v630_v3, %v554_v2 }
 0x6e5   :  { %v1179_v5 = vpop.f32.mrf.mxu1 }
 0x6e6   :  { %v644_v6 = vsel %vm166_vm3, %v631_v4, 0.0 }
 0x6e7   :  { %645 = vadd.xlane.f32.xlu1 %v644_v6  ;;  %v635_v7 = vpop.f32.mrf.mxu1 }
 0x6e8   :  { %v636_v8 = vadd.f32 %v635_v7, %v554_v2 }
 0x6e9   :  { %v1182_v9 = vpop.f32.mrf.mxu1 }
 0x6ea   :  { %v647_v10 = vsel %vm166_vm3, %v636_v8, 0.0 }
 0x6eb   :  { %648 = vadd.xlane.f32.xlu0 %v647_v10  ;;  %v640_v11 = vpop.f32.mrf.mxu1 }
 0x6ec   :  { %v641_v12 = vadd.f32 %v640_v11, %v554_v2  ;;  %v919_v2 = vld [vmem:[#allocation8 + $0x1e] ss:$0 sm:$0xff] }
 0x6ed   :  { %v1185_v13 = vpop.f32.mrf.mxu1 }
 0x6ee   :  { %v650_v14 = vsel %vm137_vm2, %v641_v12, 0.0 }
 0x6ef   :  { %651 = vadd.xlane.f32.xlu0 %v650_v14 }
 0x6f3   :  { %v889_v15 = vpop.f32.mrf.mxu1 }
 0x6f4   :  { %v890_v24 = vadd.f32 %v889_v15, %v822_v21 }
 0x6f5   :  { %v1229_v16 = vpop.f32.mrf.mxu1 }
 0x6f6   :  { %v903_v29 = vmax.f32 %v890_v24, 0.0 }
 0x6f7   :  { %v894_v17 = vpop.f32.mrf.mxu1 }
 0x6f8   :  { %v895_v30 = vadd.f32 %v894_v17, %v822_v21  ;;  %v907_v39 = vmul.f32 %v906_v35, %v903_v29  ;;  %v683_v17 = vld [vmem:[#allocation8 + $0x19] ss:$0 sm:$0xff] }
 0x6f9   :  { %v1232_v18 = vpop.f32.mrf.mxu1 }
 0x6fa   :  { %v904_v40 = vmax.f32 %v895_v30, 0.0  ;;  %v910_v46 = vsel %vm63_vm1, %v907_v39, 0.0 }
 0x6fb   :  { %v899_v19 = vpop.f32.mrf.mxu1 }
 0x6fc   :  { %v900_v32 = vadd.f32 %v899_v19, %v822_v21  ;;  %v908_v47 = vmul.f32 %v906_v35, %v904_v40  ;;  %v687_v19 = vld [vmem:[#allocation8 + $0x1a] ss:$0 sm:$0xff] }
 0x6fd   :  { %v1235_v20 = vpop.f32.mrf.mxu1 }
 0x6fe   :  { %v905_v41 = vmax.f32 %v900_v32, 0.0  ;;  %v913_v49 = vsel %vm63_vm1, %v908_v47, 0.0 }
 0x700   :  { %v909_v48 = vmul.f32 %v906_v35, %v905_v41 }
 0x702   :  { %v916_v50 = vsel %vm792_vm4, %v909_v48, 0.0 }
 0x770   :  { %v646_v22 = vpop.xlane.xlu1 %645 }
 0x771   :  { %v653_v23 = vmul.f32 0.015625, %v646_v22 }
 0x773   :  { %v1521_v25 = vsub.f32 %v631_v4, %v653_v23 }
 0x774   :  { %v649_v26 = vpop.xlane.xlu0 %648 }
 0x775   :  { %v654_v27 = vmul.f32 0.015625, %v649_v26  ;;  %v659_v28 = vmul.f32 %v1521_v25, %v1521_v25 }
 0x777   :  { %v1525_v33 = vsub.f32 %v636_v8, %v654_v27  ;;  %v662_v34 = vsel %vm166_vm3, %v659_v28, 0.0 }
 0x778   :  { %663 = vadd.xlane.f32.xlu1 %v662_v34  ;;  %v652_v36 = vpop.xlane.xlu0 %651 }
 0x779   :  { %v655_v37 = vmul.f32 0.015625, %v652_v36  ;;  %v660_v38 = vmul.f32 %v1525_v33, %v1525_v33 }
 0x77b   :  { %v1530_v42 = vsub.f32 %v641_v12, %v655_v37  ;;  %v665_v43 = vsel %vm166_vm3, %v660_v38, 0.0 }
 0x77c   :  { %666 = vadd.xlane.f32.xlu0 %v665_v43  ;;  %v942_v43 = vand.u32 127, %v367_v31  ;;  %v702_v31 = vld [vmem:[#allocation8 + $0x1b] ss:$0 sm:$0xff] }
 0x77d   :  { %v661_v44 = vmul.f32 %v1530_v42, %v1530_v42 }
 0x77e   :  { %vm943_vm5 = vcmp.eq.s32.totalorder %v942_v43, 0  ;;  %vm950_vm6 = vcmp.eq.s32.totalorder %v942_v43, 1  ;;  %vm955_vm7 = vcmp.eq.s32.totalorder %v942_v43, 2  ;;  %vm965_vm8 = vcmp.eq.s32.totalorder %v942_v43, 3 }
 0x77f   :  { %v668_v45 = vsel %vm137_vm2, %v661_v44, 0.0  ;;  %vm970_vm9 = vcmp.eq.s32.totalorder %v942_v43, 4 }
 0x780   :  { %669 = vadd.xlane.f32.xlu1 %v668_v45  ;;  %911 = vadd.xlane.f32.xlu0 %v910_v46 }
 0x784   :  { %914 = vadd.xlane.f32.xlu1 %v913_v49  ;;  %917 = vadd.xlane.f32.xlu0 %v916_v50 }
 0x801   :  { %v664_v60 = vpop.xlane.xlu1 %663 }
 0x802   :  { %v671_v61 = vmul.f32 0.015625, %v664_v60 }
 0x804   :  { %v674_v62 = vadd.f32 1e-05, %v671_v61 }
 0x805   :  { %v667_v63 = vpop.xlane.xlu0 %666 }
 0x806   :  { %1256 = vrsqrt.f32 %v674_v62  ;;  %v672_v1 = vmul.f32 0.015625, %v667_v63 }
 0x808   :  { %v675_v3 = vadd.f32 1e-05, %v672_v1 }
 0x809   :  { %v670_v4 = vpop.xlane.xlu1 %669  ;;  %v912_v5 = vpop.xlane.xlu0 %911 }
 0x80a   :  { %1258 = vrsqrt.f32 %v675_v3  ;;  %v673_v6 = vmul.f32 0.015625, %v670_v4  ;;  %v920_v7 = vadd.f32 %v919_v2, %v912_v5 }
 0x80c   :  { %v676_v8 = vadd.f32 1e-05, %v673_v6  ;;  %v1025_v9 = vmul.f32 -1.442695, %v920_v7 }
 0x80d   :  { %v915_v10 = vpop.xlane.xlu1 %914  ;;  %v918_v11 = vpop.xlane.xlu0 %917 }
 0x80e   :  { %1260 = vrsqrt.f32 %v676_v8  ;;  %v921_v12 = vadd.f32 %v919_v2, %v915_v10  ;;  %v922_v13 = vadd.f32 %v919_v2, %v918_v11 }
 0x80f   :  { %1262 = vpow2.f32 %v1025_v9 }
 0x810   :  { %v1026_v14 = vmul.f32 -1.442695, %v921_v12  ;;  %v1027_v15 = vmul.f32 -1.442695, %v922_v13 }
 0x812   :  { %1264 = vpow2.f32 %v1026_v14 }
 0x813   :  { %v1257_v16 = vpop.eup %1256  ;;  %1266 = vpow2.f32 %v1027_v15 }
 0x814   :  { %v680_v18 = vmul.f32 %v1257_v16, %v1521_v25 }
 0x816   :  { %v684_v20 = vmul.f32 %v683_v17, %v680_v18 }
 0x817   :  { %v1259_v21 = vpop.eup %1258 }
 0x818   :  { %v688_v22 = vadd.f32 %v687_v19, %v684_v20  ;;  %v681_v23 = vmul.f32 %v1259_v21, %v1525_v33 }
 0x81a   :  { %v691_v24 = vmax.f32 %v688_v22, 0.0  ;;  %v685_v26 = vmul.f32 %v683_v17, %v681_v23 }
 0x81b   :  { %v1261_v27 = vpop.eup %1260 }
 0x81c   :  { %v1263_v28 = vpop.eup %1262  ;;  %1203 = vmatmul.mubr.msk.f32.vlgmr.msra.gmra.mxu0 %vm166_vm3, %v691_v24  ;;  %v689_v29 = vadd.f32 %v687_v19, %v685_v26  ;;  %v682_v30 = vmul.f32 %v1261_v27, %v1530_v42 }
 0x81d   :  { %v932_v32 = vadd.f32 1.0, %v1263_v28  ;;  %1205 = vmatprep.mubr.msk.f32.mxu0 %vm1370_vm0, %v1369_v0 }
 0x81e   :  { %v692_v25 = vmax.f32 %v689_v29, 0.0  ;;  %v686_v34 = vmul.f32 %v683_v17, %v682_v30 }
 0x81f   :  { %v1265_v35 = vpop.eup %1264  ;;  %1268 = vrcp.f32 %v932_v32 }
 0x820   :  { %v1267_v36 = vpop.eup %1266  ;;  %v933_v37 = vadd.f32 1.0, %v1265_v35  ;;  %1206 = vmatmul.mubr.msk.f32.gmra.mxu0 %vm166_vm3, %v692_v25  ;;  %v690_v33 = vadd.f32 %v687_v19, %v686_v34 }
 0x821   :  { %v934_v38 = vadd.f32 1.0, %v1267_v36  ;;  %1208 = vmatprep.mubr.msk.f32.mxu0 %vm1370_vm0, %v1369_v0 }
 0x822   :  { %1270 = vrcp.f32 %v933_v37  ;;  %v693_v39 = vmax.f32 %v690_v33, 0.0 }
 0x823   :  { %1272 = vrcp.f32 %v934_v38 }
 0x824   :  { %1209 = vmatmul.mubr.msk.f32.gmra.mxu0 %vm166_vm3, %v693_v39 }
 0x82c   :  { %v1269_v40 = vpop.eup %1268 }
 0x82d   :  { %946 = vperm.xlu1 %1250, %v1269_v40  }
 0x82f   :  { %v1271_v41 = vpop.eup %1270 }
 0x830   :  { %v1273_v42 = vpop.eup %1272  ;;  %958 = vperm.xlu0 %1251, %v1271_v41  }
 0x831   :  { %973 = vperm.xlu1 %1250, %v1273_v42  }
 0x8a8   :  { %v947_v44 = vpop.permute.xlu1 %946 }
 0x8a9   :  { %v949_v45 = vsel %vm943_vm5, %v947_v44, 0.0 }
 0x8aa   :  { %v952_v46 = vrot.slane %v949_v45, 4 }
 0x8ab   :  { %v959_v48 = vpop.permute.xlu0 %958 }
 0x8ac   :  { %v954_v47 = vsel %vm950_vm6, %v947_v44, %v952_v46  ;;  %v974_v53 = vpop.permute.xlu1 %973 }
 0x8ad   :  { %v962_v0 = vrot.slane %v954_v47, 4 }
 0x8af   :  { %v964_v49 = vsel %vm955_vm7, %v959_v48, %v962_v0 }
 0x8b0   :  { %v967_v50 = vrot.slane %v964_v49, 4 }
 0x8b2   :  { %v969_v51 = vsel %vm965_vm8, %v959_v48, %v967_v50 }
 0x8b3   :  { %v977_v52 = vrot.slane %v969_v51, 4 }
 0x8b5   :  { %v979_v54 = vsel %vm970_vm9, %v974_v53, %v977_v52 }
 0x8b6   :  { %v981_v55 = vsel %vm980_vm10, %v979_v54, 0.0 }
 0x8b7   :  { %982 = vadd.xlane.f32.xlu1 %v981_v55 }
 0x8dc   :  { %v778_v56 = vpop.f32.mrf.mxu0 }
 0x8dd   :  { %v779_v57 = vadd.f32 %v778_v56, %v702_v31 }
 0x8de   :  { %v1204_v58 = vpop.f32.mrf.mxu0 }
 0x8df   :  { %793 = vst.msk [vmem:[%s1581_s3] sm:$0xf] %vm792_vm4, %v779_v57  ;;  %v795_v59 = vcombine.high %v779_v57, %v779_v57 }
 0x8e0   :  { %v783_v60 = vpop.f32.mrf.mxu0 }
 0x8e1   :  { %796 = vrot.lane.b32.xlu0 %v795_v59, %s1373_s15  ;;  %v784_v62 = vadd.f32 %v783_v60, %v702_v31 }
 0x8e2   :  { %v1207_v61 = vpop.f32.mrf.mxu0 }
 0x8e3   :  { %v807_v3 = vcombine.high %v784_v62, %v784_v62 }
 0x8e4   :  { %v788_v63 = vpop.f32.mrf.mxu0 }
 0x8e5   :  { %v789_v1 = vadd.f32 %v788_v63, %v702_v31  ;;  %802 = vrot.lane.b32.xlu0 %v784_v62, %s1371_s11 }
 0x8e6   :  { %v1210_v2 = vpop.f32.mrf.mxu0 }
 0x8e7   :  { %813 = vst.msk [vmem:[%s1581_s3 + $0x4] sm:$0xf] %vm792_vm4, %v789_v1 }
 0x8e9   :  { %808 = vrot.lane.b32.xlu0 %v807_v3, %s1374_s18 }
 0x940   :  { %v983_v4 = vpop.xlane.xlu1 %982 }
 0x941   :  { %1274 = vrcp.f32 %v983_v4 }
 0x94e   :  { %v1275_v5 = vpop.eup %1274 }
 0x94f   :  { %v985_v6 = vmul.f32 %v1275_v5, %v979_v54 }
 0x951   :  { %986 = vst [vmem:[#allocation9] sm:$0xf] %v985_v6 }
 0x952   :  { %1347 = shalt.err (!%p1344_p5)
}
 0x953   :  { %998 = dma.vmem_to_hbm [thread:$0]  %s996_s20, 64, %s1582_s4, [#allocation5]   ;;  %v797_v7 = vpop.permute.xlu0 %796  ;;  %vm805_vm12 = vcmask 781824   ;;  %vm811_vm13 = vcmask 1044224  }
 0x954   :  { %800 = vst.msk [vmem:[%s1581_s3] sm:$0xf] %vm799_vm11, %v797_v7 }
 0x957   :  { %v803_v8 = vpop.permute.xlu0 %802 }
 0x958   :  { %806 = vst.msk [vmem:[%s1581_s3] sm:$0xf] %vm805_vm12, %v803_v8 }
 0x95b   :  { %v809_v9 = vpop.permute.xlu0 %808 }
 0x95c   :  { %812 = vst.msk [vmem:[%s1581_s3] sm:$0xf] %vm811_vm13, %v809_v9 }
 0x95d   :  { %1360 = dma.done.wait [#allocation5], 64  }
 0x95e   :  { %1361 = vsyncadd [#allocation5], 4294967232 }
 0x95f   :  { %1008 = vsyncpa [#allocation4], 1 }
 0x960   :  { %1009 = vsyncpa [#allocation7], 1 }
 0x961   :  { %1010 = vsyncpa [#allocation5], 1 }

</bundles_post_ra>
